<compile_context>
chip_gen: v6e
topology: v6e:2x2x1
jax: 0.10.0
libtpu: 0.0.40
codegen_flags: <defaults>
</compile_context>

<pallas_src>
import functools

import jax
import jax.numpy as jnp
from jax import lax
from jax.experimental import pallas as pl
from jax.experimental.pallas import tpu as pltpu


def _cdiv(a, b):
    return -(-a // b)


def _round_up(v, m):
    return _cdiv(v, m) * m


def _ce_batchdice_kernel(x_ref, t_ref, ce_ref, p0_ref, pt_ref, nz_ref, *,
                         n_classes, tile_hw, tiles_per_split, n_pixels,
                         needs_mask):
    j = pl.program_id(2)                      # tile index within this spatial half

    @pl.when(j == 0)
    def _():
        ce_ref[...] = jnp.zeros_like(ce_ref)
        p0_ref[...] = jnp.zeros_like(p0_ref)
        pt_ref[...] = jnp.zeros_like(pt_ref)
        nz_ref[...] = jnp.zeros_like(nz_ref)

    C, THW = n_classes, tile_hw

    xf = x_ref[0].astype(jnp.float32)         # (C, THW) logits (bf16/f32 transport)
    t = t_ref[0].astype(jnp.int32)            # (1, THW) class ids (int8/int32 transport)

    # numerically stable log-sum-exp / softmax pieces over the class (sublane) axis
    m = jnp.max(xf, axis=0, keepdims=True)                      # (1, THW)
    e = jnp.exp(xf - m)                                         # (C, THW)
    den = jnp.sum(e, axis=0, keepdims=True)                     # (1, THW)
    rden = pl.reciprocal(den, approx=True)                      # EUP; dice terms only
    logsumexp = jnp.log(den) + m                                # exact path for CE

    cls = lax.broadcasted_iota(jnp.int32, (C, THW), 0)
    tgt_logit = jnp.sum(jnp.where(cls == t, xf, 0.0), axis=0, keepdims=True)
    nll = logsumexp - tgt_logit                                 # -log softmax[target]

    p0 = e[0:1, :] * rden                                       # softmax prob of class 0
    pt = jnp.exp(tgt_logit - m) * rden                          # softmax prob of target
    nz = t != 0                                                 # target class has weight

    if needs_mask:
        # Only the ragged / phantom tail tiles contain invalid lanes.  Use selects (not
        # multiplies) so garbage/NaN from the unfilled part of a partial block cannot
        # propagate into the sums.
        base = (pl.program_id(1) * tiles_per_split + j) * THW
        lane = lax.broadcasted_iota(jnp.int32, (1, THW), 1)
        valid = (base + lane) < n_pixels
        nll = jnp.where(valid, nll, 0.0)
        p0 = jnp.where(valid, p0, 0.0)
        sel = jnp.logical_and(valid, nz)
    else:
        sel = nz

    pt = jnp.where(sel, pt, 0.0)
    nz_f = jnp.where(sel, 1.0, 0.0)

    ce_ref[...] = ce_ref[...] + jnp.reshape(jnp.sum(nll), (1, 1, 1))
    p0_ref[...] = p0_ref[...] + jnp.reshape(jnp.sum(p0), (1, 1, 1))
    pt_ref[...] = pt_ref[...] + jnp.reshape(jnp.sum(pt), (1, 1, 1))
    nz_ref[...] = nz_ref[...] + jnp.reshape(jnp.sum(nz_f), (1, 1, 1))


def ce_batchdice_loss(logits, target, *, block_budget_bytes=2 << 20):
    """logits: (N, C, H, W) float, target: (N, H, W) int -> scalar float32 loss."""
    N, C, H, W = logits.shape
    HW = H * W

    x = logits.reshape(N, C, HW)              # native-dtype transport (bf16 ok)
    if jnp.issubdtype(target.dtype, jnp.integer) and jnp.dtype(target.dtype).itemsize == 1:
        t = target.reshape(N, 1, HW)          # 1 byte/pixel transport (C <= 255)
    else:
        t = target.reshape(N, 1, HW).astype(jnp.int32)

    # ---- spatial tiling: pick the tile straight from the VMEM byte budget ----
    itemsize = jnp.dtype(x.dtype).itemsize
    lanes_budget = max(128, (block_budget_bytes // max(1, C * itemsize)) // 128 * 128)
    min_tiles = _cdiv(_round_up(HW, 128), lanes_budget)
    if min_tiles == 1:
        tile = HW                             # one block == full extent: no masking at all
    else:
        tile = _round_up(_cdiv(HW, min_tiles), 128)   # balanced 128-aligned tiles
    needed = _cdiv(HW, tile)                  # real blocks along the HW axis
    n_split = 2 if needed >= 2 else 1         # 2nd parallel axis (v7x megacore)
    tiles_per_split = _cdiv(needed, n_split)
    total_tiles = n_split * tiles_per_split   # may exceed `needed` by one phantom tile
    needs_mask = (total_tiles * tile != HW)

    if total_tiles > needed:
        # phantom tile: clamp onto the last real block; its lanes are fully masked
        def spatial_idx(s, j):
            return jnp.minimum(s * tiles_per_split + j, needed - 1)
    else:
        def spatial_idx(s, j):
            return s * tiles_per_split + j

    kernel = functools.partial(
        _ce_batchdice_kernel, n_classes=C, tile_hw=tile,
        tiles_per_split=tiles_per_split, n_pixels=HW, needs_mask=needs_mask)

    part_shape = jax.ShapeDtypeStruct((N, n_split, 1), jnp.float32)
    part_spec = pl.BlockSpec((1, 1, 1), lambda i, s, j: (i, s, 0))

    ce_b, p0_b, pt_b, nz_b = pl.pallas_call(
        kernel,
        out_shape=(part_shape,) * 4,
        grid_spec=pltpu.PrefetchScalarGridSpec(
            num_scalar_prefetch=0,
            grid=(N, n_split, tiles_per_split),
            in_specs=[
                pl.BlockSpec((1, C, tile), lambda i, s, j: (i, 0, spatial_idx(s, j))),
                pl.BlockSpec((1, 1, tile), lambda i, s, j: (i, 0, spatial_idx(s, j))),
            ],
            out_specs=(part_spec,) * 4),
        compiler_params=pltpu.CompilerParams(
            dimension_semantics=("parallel", "parallel", "arbitrary"),
            vmem_limit_bytes=32 * 1024 * 1024),
    )(x, t)

    # ---- scalar epilogue (hoisted out of the kernel) ----
    smooth = 1e-10
    total_px = float(N * HW)
    inv = (1.0 / (C - 1)) if C > 1 else 0.0   # C == 1 -> all dice weights 0 -> dice = 1
    ce = jnp.sum(ce_b) / total_px
    inter = (inv * inv) * jnp.sum(pt_b)                 # sum w^2 * p * onehot
    psum = inv * (total_px - jnp.sum(p0_b))             # sum w * p   (uses sum_c p == 1)
    tsum = inv * jnp.sum(nz_b)                          # sum w * onehot
    dice = 1.0 - 2.0 * inter / (psum + tsum + smooth)
    return ce + dice


def _ref_ce_batchdice(logits, target):
    """Pure-JAX reference mirroring the PyTorch CE_BatchDiceLoss."""
    N, C, H, W = logits.shape
    x = logits.astype(jnp.float32)
    logp = jax.nn.log_softmax(x, axis=1)
    onehot = jax.nn.one_hot(target, C, axis=1, dtype=jnp.float32)   # (N,C,H,W)
    ce = -jnp.mean(jnp.sum(logp * onehot, axis=1))

    p = jax.nn.softmax(x, axis=1)
    w = jnp.full((1, C, 1), 1.0 / (C - 1), jnp.float32).at[0, 0, 0].set(0.0)
    pf = p.reshape(N, C, -1) * w
    tf = onehot.reshape(N, C, -1) * w
    dice = 1.0 - 2.0 * jnp.sum(pf * tf) / (jnp.sum(pf) + jnp.sum(tf) + 1e-10)
    return ce + dice


if __name__ == "__main__":
    key = jax.random.PRNGKey(0)
    k1, k2, k3, k4 = jax.random.split(key, 4)

    # Case 1: aligned single-tile path, f32 logits, int8 target transport.
    N, C, H, W = 2, 4, 16, 16
    logits = jax.random.normal(k1, (N, C, H, W), dtype=jnp.float32)
    target = jax.random.randint(k2, (N, H, W), 0, C, dtype=jnp.int32).astype(jnp.int8)
    loss = jax.block_until_ready(jax.jit(ce_batchdice_loss)(logits, target))
    ref = jax.block_until_ready(_ref_ce_batchdice(logits, target))
    assert jnp.isfinite(loss), f"non-finite loss: {loss}"
    assert jnp.allclose(loss, ref, rtol=1e-3, atol=1e-3), (loss, ref)

    # Case 2: ragged HW (not a multiple of 128), bf16 logits, forced multi-tile with the
    # split spatial axis + a phantom tile (exercises the masked-tail / clamped index path).
    N2, C2, H2, W2 = 1, 3, 15, 20
    logits2 = jax.random.normal(k3, (N2, C2, H2, W2), dtype=jnp.bfloat16)
    target2 = jax.random.randint(k4, (N2, H2, W2), 0, C2, dtype=jnp.int32).astype(jnp.int8)
    f2 = jax.jit(functools.partial(ce_batchdice_loss, block_budget_bytes=1024))
    loss2 = jax.block_until_ready(f2(logits2, target2))
    ref2 = jax.block_until_ready(_ref_ce_batchdice(logits2, target2))
    assert jnp.isfinite(loss2), f"non-finite loss: {loss2}"
    assert jnp.allclose(loss2, ref2, rtol=2e-3, atol=2e-3), (loss2, ref2)

    print("KERNEL_OK")
</pallas_src>

<mosaic_0001>
module attributes {stable_mosaic.version = 11 : i64} {
  func.func @_ce_batchdice_kernel(%arg0: i32, %arg1: i32, %arg2: i32, %arg3: memref<1x4x256xf32, #tpu.memory_space<vmem>>, %arg4: memref<1x1x256xi8, #tpu.memory_space<vmem>>, %arg5: memref<1x1x1xf32, #tpu.memory_space<vmem>>, %arg6: memref<1x1x1xf32, #tpu.memory_space<vmem>>, %arg7: memref<1x1x1xf32, #tpu.memory_space<vmem>>, %arg8: memref<1x1x1xf32, #tpu.memory_space<vmem>>) attributes {dimension_semantics = [#tpu.dimension_semantics<parallel>, #tpu.dimension_semantics<parallel>, #tpu.dimension_semantics<arbitrary>], iteration_bounds = array<i64: 2, 1, 1>, scalar_prefetch = 0 : i64, scratch_operands = 0 : i64, tpu.core_type = #tpu.core_type<tc>, window_params = [{transform_indices = @transform_0, window_bounds = array<i64: 1, 4, 256>}, {transform_indices = @transform_1, window_bounds = array<i64: 1, 1, 256>}, {transform_indices = @transform_2, window_bounds = array<i64: 1, 1, 1>}, {transform_indices = @transform_3, window_bounds = array<i64: 1, 1, 1>}, {transform_indices = @transform_4, window_bounds = array<i64: 1, 1, 1>}, {transform_indices = @transform_5, window_bounds = array<i64: 1, 1, 1>}]} {
    %c0_i32 = arith.constant 0 : i32
    %0 = arith.cmpi eq, %arg2, %c0_i32 : i32
    %1 = arith.extui %0 : i1 to i32
    %c0_i32_0 = arith.constant 0 : i32
    %2 = arith.cmpi ne, %1, %c0_i32_0 : i32
    scf.if %2 {
      %cst_41 = arith.constant 0.000000e+00 : f32
      %70 = vector.broadcast %cst_41 : f32 to vector<1x1x1xf32>
      %c0_42 = arith.constant 0 : index
      %c0_43 = arith.constant 0 : index
      %c0_44 = arith.constant 0 : index
      %71 = vector.load %arg5[%c0_42, %c0_43, %c0_44] : memref<1x1x1xf32, #tpu.memory_space<vmem>>, vector<1x1x1xf32>
      tpu.vector_store %arg5[%c0_42, %c0_43, %c0_44], %70 {strides = array<i32>} : memref<1x1x1xf32, #tpu.memory_space<vmem>>, vector<1x1x1xf32>,
      %cst_45 = arith.constant 0.000000e+00 : f32
      %72 = vector.broadcast %cst_45 : f32 to vector<1x1x1xf32>
      %c0_46 = arith.constant 0 : index
      %c0_47 = arith.constant 0 : index
      %c0_48 = arith.constant 0 : index
      %73 = vector.load %arg6[%c0_46, %c0_47, %c0_48] : memref<1x1x1xf32, #tpu.memory_space<vmem>>, vector<1x1x1xf32>
      tpu.vector_store %arg6[%c0_46, %c0_47, %c0_48], %72 {strides = array<i32>} : memref<1x1x1xf32, #tpu.memory_space<vmem>>, vector<1x1x1xf32>,
      %cst_49 = arith.constant 0.000000e+00 : f32
      %74 = vector.broadcast %cst_49 : f32 to vector<1x1x1xf32>
      %c0_50 = arith.constant 0 : index
      %c0_51 = arith.constant 0 : index
      %c0_52 = arith.constant 0 : index
      %75 = vector.load %arg7[%c0_50, %c0_51, %c0_52] : memref<1x1x1xf32, #tpu.memory_space<vmem>>, vector<1x1x1xf32>
      tpu.vector_store %arg7[%c0_50, %c0_51, %c0_52], %74 {strides = array<i32>} : memref<1x1x1xf32, #tpu.memory_space<vmem>>, vector<1x1x1xf32>,
      %cst_53 = arith.constant 0.000000e+00 : f32
      %76 = vector.broadcast %cst_53 : f32 to vector<1x1x1xf32>
      %c0_54 = arith.constant 0 : index
      %c0_55 = arith.constant 0 : index
      %c0_56 = arith.constant 0 : index
      %77 = vector.load %arg8[%c0_54, %c0_55, %c0_56] : memref<1x1x1xf32, #tpu.memory_space<vmem>>, vector<1x1x1xf32>
      tpu.vector_store %arg8[%c0_54, %c0_55, %c0_56], %76 {strides = array<i32>} : memref<1x1x1xf32, #tpu.memory_space<vmem>>, vector<1x1x1xf32>,
    } else {
    }
    %c0 = arith.constant 0 : index
    %c0_1 = arith.constant 0 : index
    %c0_2 = arith.constant 0 : index
    %3 = vector.load %arg3[%c0, %c0_1, %c0_2] : memref<1x4x256xf32, #tpu.memory_space<vmem>>, vector<1x4x256xf32>
    %4 = vector.shape_cast %3 : vector<1x4x256xf32> to vector<4x256xf32>
    %c0_3 = arith.constant 0 : index
    %c0_4 = arith.constant 0 : index
    %c0_5 = arith.constant 0 : index
    %5 = vector.load %arg4[%c0_3, %c0_4, %c0_5] : memref<1x1x256xi8, #tpu.memory_space<vmem>>, vector<1x1x256xi8>
    %6 = vector.shape_cast %5 : vector<1x1x256xi8> to vector<1x256xi8>
    %7 = arith.extsi %6 : vector<1x256xi8> to vector<1x256xi32>
    %cst = arith.constant dense<0xFF800000> : vector<256xf32>
    %8 = vector.multi_reduction <maximumf>, %4, %cst [0] : vector<4x256xf32> to vector<256xf32>
    %9 = vector.shape_cast %8 : vector<256xf32> to vector<1x256xf32>
    %10 = vector.broadcast %9 : vector<1x256xf32> to vector<4x256xf32>
    %11 = arith.subf %4, %10 : vector<4x256xf32>
    %12 = math.exp %11 : vector<4x256xf32>
    %cst_6 = arith.constant dense<0.000000e+00> : vector<256xf32>
    %13 = vector.multi_reduction <add>, %12, %cst_6 [0] : vector<4x256xf32> to vector<256xf32>
    %14 = vector.shape_cast %13 : vector<256xf32> to vector<1x256xf32>
    %15 = tpu.reciprocal %14 {approx = true} : vector<1x256xf32> -> vector<1x256xf32>
    %16 = math.log %14 : vector<1x256xf32>
    %17 = arith.addf %16, %9 : vector<1x256xf32>
    %18 = tpu.iota {dimensions = array<i32: 0>} : vector<4x256xi32>
    %19 = vector.broadcast %7 : vector<1x256xi32> to vector<4x256xi32>
    %20 = arith.cmpi eq, %18, %19 : vector<4x256xi32>
    %cst_7 = arith.constant 0.000000e+00 : f32
    %21 = vector.broadcast %cst_7 : f32 to vector<4x256xf32>
    %22 = arith.select %20, %4, %21 : vector<4x256xi1>, vector<4x256xf32>
    %cst_8 = arith.constant dense<0.000000e+00> : vector<256xf32>
    %23 = vector.multi_reduction <add>, %22, %cst_8 [0] : vector<4x256xf32> to vector<256xf32>
    %24 = vector.shape_cast %23 : vector<256xf32> to vector<1x256xf32>
    %25 = arith.subf %17, %24 : vector<1x256xf32>
    %26 = vector.extract_strided_slice %12 {offsets = [0, 0], sizes = [1, 256], strides = [1, 1]} : vector<4x256xf32> to vector<1x256xf32>
    %27 = arith.mulf %26, %15 : vector<1x256xf32>
    %28 = arith.subf %24, %9 : vector<1x256xf32>
    %29 = math.exp %28 : vector<1x256xf32>
    %30 = arith.mulf %29, %15 : vector<1x256xf32>
    %c0_i32_9 = arith.constant 0 : i32
    %31 = vector.broadcast %c0_i32_9 : i32 to vector<1x256xi32>
    %32 = arith.cmpi ne, %7, %31 : vector<1x256xi32>
    %cst_10 = arith.constant 0.000000e+00 : f32
    %33 = vector.broadcast %cst_10 : f32 to vector<1x256xf32>
    %34 = arith.select %32, %30, %33 : vector<1x256xi1>, vector<1x256xf32>
    %cst_11 = arith.constant 1.000000e+00 : f32
    %cst_12 = arith.constant 0.000000e+00 : f32
    %35 = vector.broadcast %cst_11 : f32 to vector<1x256xf32>
    %36 = vector.broadcast %cst_12 : f32 to vector<1x256xf32>
    %37 = arith.select %32, %35, %36 : vector<1x256xi1>, vector<1x256xf32>
    %c0_13 = arith.constant 0 : index
    %c0_14 = arith.constant 0 : index
    %c0_15 = arith.constant 0 : index
    %38 = vector.load %arg5[%c0_13, %c0_14, %c0_15] : memref<1x1x1xf32, #tpu.memory_space<vmem>>, vector<1x1x1xf32>
    %39 = vector.shape_cast %25 : vector<1x256xf32> to vector<1x1x256xf32>
    %cst_16 = arith.constant dense<0.000000e+00> : vector<1xf32>
    %40 = vector.multi_reduction <add>, %39, %cst_16 [1, 2] : vector<1x1x256xf32> to vector<1xf32>
    %41 = vector.shape_cast %40 : vector<1xf32> to vector<1x1x1xf32>
    %42 = vector.extract %41[0, 0, 0] : f32 from vector<1x1x1xf32>
    %43 = vector.broadcast %42 : f32 to vector<1x1x1xf32>
    %44 = arith.addf %38, %43 : vector<1x1x1xf32>
    %c0_17 = arith.constant 0 : index
    %c0_18 = arith.constant 0 : index
    %c0_19 = arith.constant 0 : index
    %45 = vector.load %arg5[%c0_17, %c0_18, %c0_19] : memref<1x1x1xf32, #tpu.memory_space<vmem>>, vector<1x1x1xf32>
    tpu.vector_store %arg5[%c0_17, %c0_18, %c0_19], %44 {strides = array<i32>} : memref<1x1x1xf32, #tpu.memory_space<vmem>>, vector<1x1x1xf32>,
    %c0_20 = arith.constant 0 : index
    %c0_21 = arith.constant 0 : index
    %c0_22 = arith.constant 0 : index
    %46 = vector.load %arg6[%c0_20, %c0_21, %c0_22] : memref<1x1x1xf32, #tpu.memory_space<vmem>>, vector<1x1x1xf32>
    %47 = vector.shape_cast %27 : vector<1x256xf32> to vector<1x1x256xf32>
    %cst_23 = arith.constant dense<0.000000e+00> : vector<1xf32>
    %48 = vector.multi_reduction <add>, %47, %cst_23 [1, 2] : vector<1x1x256xf32> to vector<1xf32>
    %49 = vector.shape_cast %48 : vector<1xf32> to vector<1x1x1xf32>
    %50 = vector.extract %49[0, 0, 0] : f32 from vector<1x1x1xf32>
    %51 = vector.broadcast %50 : f32 to vector<1x1x1xf32>
    %52 = arith.addf %46, %51 : vector<1x1x1xf32>
    %c0_24 = arith.constant 0 : index
    %c0_25 = arith.constant 0 : index
    %c0_26 = arith.constant 0 : index
    %53 = vector.load %arg6[%c0_24, %c0_25, %c0_26] : memref<1x1x1xf32, #tpu.memory_space<vmem>>, vector<1x1x1xf32>
    tpu.vector_store %arg6[%c0_24, %c0_25, %c0_26], %52 {strides = array<i32>} : memref<1x1x1xf32, #tpu.memory_space<vmem>>, vector<1x1x1xf32>,
    %c0_27 = arith.constant 0 : index
    %c0_28 = arith.constant 0 : index
    %c0_29 = arith.constant 0 : index
    %54 = vector.load %arg7[%c0_27, %c0_28, %c0_29] : memref<1x1x1xf32, #tpu.memory_space<vmem>>, vector<1x1x1xf32>
    %55 = vector.shape_cast %34 : vector<1x256xf32> to vector<1x1x256xf32>
    %cst_30 = arith.constant dense<0.000000e+00> : vector<1xf32>
    %56 = vector.multi_reduction <add>, %55, %cst_30 [1, 2] : vector<1x1x256xf32> to vector<1xf32>
    %57 = vector.shape_cast %56 : vector<1xf32> to vector<1x1x1xf32>
    %58 = vector.extract %57[0, 0, 0] : f32 from vector<1x1x1xf32>
    %59 = vector.broadcast %58 : f32 to vector<1x1x1xf32>
    %60 = arith.addf %54, %59 : vector<1x1x1xf32>
    %c0_31 = arith.constant 0 : index
    %c0_32 = arith.constant 0 : index
    %c0_33 = arith.constant 0 : index
    %61 = vector.load %arg7[%c0_31, %c0_32, %c0_33] : memref<1x1x1xf32, #tpu.memory_space<vmem>>, vector<1x1x1xf32>
    tpu.vector_store %arg7[%c0_31, %c0_32, %c0_33], %60 {strides = array<i32>} : memref<1x1x1xf32, #tpu.memory_space<vmem>>, vector<1x1x1xf32>,
    %c0_34 = arith.constant 0 : index
    %c0_35 = arith.constant 0 : index
    %c0_36 = arith.constant 0 : index
    %62 = vector.load %arg8[%c0_34, %c0_35, %c0_36] : memref<1x1x1xf32, #tpu.memory_space<vmem>>, vector<1x1x1xf32>
    %63 = vector.shape_cast %37 : vector<1x256xf32> to vector<1x1x256xf32>
    %cst_37 = arith.constant dense<0.000000e+00> : vector<1xf32>
    %64 = vector.multi_reduction <add>, %63, %cst_37 [1, 2] : vector<1x1x256xf32> to vector<1xf32>
    %65 = vector.shape_cast %64 : vector<1xf32> to vector<1x1x1xf32>
    %66 = vector.extract %65[0, 0, 0] : f32 from vector<1x1x1xf32>
    %67 = vector.broadcast %66 : f32 to vector<1x1x1xf32>
    %68 = arith.addf %62, %67 : vector<1x1x1xf32>
    %c0_38 = arith.constant 0 : index
    %c0_39 = arith.constant 0 : index
    %c0_40 = arith.constant 0 : index
    %69 = vector.load %arg8[%c0_38, %c0_39, %c0_40] : memref<1x1x1xf32, #tpu.memory_space<vmem>>, vector<1x1x1xf32>
    tpu.vector_store %arg8[%c0_38, %c0_39, %c0_40], %68 {strides = array<i32>} : memref<1x1x1xf32, #tpu.memory_space<vmem>>, vector<1x1x1xf32>,
    return
  }
  func.func @transform_0(%arg0: i32, %arg1: i32, %arg2: i32) -> (i32, i32, i32) {
    %c1_i32 = arith.constant 1 : i32
    %0 = arith.muli %arg1, %c1_i32 : i32
    %1 = arith.addi %0, %arg2 : i32
    %c0_i32 = arith.constant 0 : i32
    %c0_i32_0 = arith.constant 0 : i32
    return %arg0, %c0_i32, %1 : i32, i32, i32
  }
  func.func @transform_1(%arg0: i32, %arg1: i32, %arg2: i32) -> (i32, i32, i32) {
    %c1_i32 = arith.constant 1 : i32
    %0 = arith.muli %arg1, %c1_i32 : i32
    %1 = arith.addi %0, %arg2 : i32
    %c0_i32 = arith.constant 0 : i32
    %c0_i32_0 = arith.constant 0 : i32
    return %arg0, %c0_i32, %1 : i32, i32, i32
  }
  func.func @transform_2(%arg0: i32, %arg1: i32, %arg2: i32) -> (i32, i32, i32) {
    %c0_i32 = arith.constant 0 : i32
    %c0_i32_0 = arith.constant 0 : i32
    return %arg0, %arg1, %c0_i32 : i32, i32, i32
  }
  func.func @transform_3(%arg0: i32, %arg1: i32, %arg2: i32) -> (i32, i32, i32) {
    %c0_i32 = arith.constant 0 : i32
    %c0_i32_0 = arith.constant 0 : i32
    return %arg0, %arg1, %c0_i32 : i32, i32, i32
  }
  func.func @transform_4(%arg0: i32, %arg1: i32, %arg2: i32) -> (i32, i32, i32) {
    %c0_i32 = arith.constant 0 : i32
    %c0_i32_0 = arith.constant 0 : i32
    return %arg0, %arg1, %c0_i32 : i32, i32, i32
  }
  func.func @transform_5(%arg0: i32, %arg1: i32, %arg2: i32) -> (i32, i32, i32) {
    %c0_i32 = arith.constant 0 : i32
    %c0_i32_0 = arith.constant 0 : i32
    return %arg0, %arg1, %c0_i32 : i32, i32, i32
  }
}

</mosaic_0001>

<bundles_post_ra>
// kernel: ce_batchdice_loss.1
= control target key start
LH: loop header
LB: loop body
LE: loop exit
PB: predicated region body
PF: predicated region fallthrough
CT: control target
= control target key end

     0   :  { %s887_s18 = smov 0   ;;  %s889_s19 = smov 0   ;;  %s1001_s0 = inlined_call_operand.vmem [shape: f32[2,4,256], index: 0, kind: input, shape index: {}]   ;;  %s1002_s1 = inlined_call_operand.vmem [shape: s8[2,1,256], index: 1, kind: input, shape index: {}]   ;;  %s1003_s2 = inlined_call_operand.vmem [shape: f32[2,1,1], index: 2, kind: output, shape index: {0}]   ;;  %s1004_s3 = inlined_call_operand.vmem [shape: f32[2,1,1], index: 3, kind: output, shape index: {1}]   ;;  %s1005_s4 = inlined_call_operand.vmem [shape: f32[2,1,1], index: 4, kind: output, shape index: {2}]   ;;  %s1006_s5 = inlined_call_operand.vmem [shape: f32[2,1,1], index: 5, kind: output, shape index: {3}]  }
   0x1   :  { %s891_s20 = smov 0  }
   0x2 LB: > { %s35_s21 = sadd.s32 1, %s850_s19  ;;  %p777_p0 = scmp.ge.s32.totalorder %s854_s20, 1  ;;  %s854_s20 = sphi %s891_s20, %s16_s20   ;;  %s850_s19 = sphi %s889_s19, %s1008_s19   ;;  %s846_s18 = sphi %s887_s18, %s1007_s18  }
   0x3   : > { %p37_p1 = scmp.ge.s32.totalorder %s35_s21, 2  ;;  %p252_p2 = scmp.lt.s32.totalorder %s854_s20, 3 }
   0x5   : > { %s1010_s21 = smov (%p37_p1, %s35_s21), 0  ;;  %p253_p3 = pnand %p777_p0, %p252_p2 }
   0x6   : > { %p315_p4 = scmp.lt.s32.totalorder (!%p253_p3), %s846_s18, 1 }
   0x7   : > { %256 = sbr.rel (%p253_p3) target bundleno = 299 (0x12b), region = 28 }
   0xc   : > { %v422_v0 = vlaneseq  ;;  %s1012_s18 = smov (!%p315_p4, %s846_s18), 1  ;;  %vm375_vm0 = vcmask 1043456   ;;  %vm481_vm4 = vcmask 1040384   ;;  %vm364_vm5 = vcmask 0  }
   0xd   : > { %s783_s22 = sshll.u32 %s1012_s18, 3  ;;  %s780_s23 = sshll.u32 %s1012_s18, 1 }
   0xe   : > { %v423_v1 = vshrl.u32 %v422_v0, 7  ;;  %s322_s26 = scalar_lea.vmem %s1001_s0, %s783_s22  ;;  %s333_s29 = scalar_lea.vmem %s1002_s1, %s780_s23 }
   0xf   : > { %v369_v4 = vld [vmem:[%s322_s26] sm:$0xff]  ;;  %s952_s7 = scalar_lea.vmem %s1003_s2, %s1012_s18  ;;  %s960_s10 = scalar_lea.vmem %s1004_s3, %s1012_s18 }
  0x10   : > { %v915_v2 = vsub.s32 0, %v423_v1  ;;  %v917_v3 = vsub.s32 4, %v423_v1  ;;  %v370_v5 = vld [vmem:[%s333_s29] sm:$0x3]  ;;  %v373_v7 = vcombine.high %v369_v4, %v369_v4  ;;  %v376_v8 = vsel %vm375_vm0, %v369_v4, -inf  ;;  %s966_s13 = scalar_lea.vmem %s1005_s4, %s1012_s18  ;;  %s976_s16 = scalar_lea.vmem %s1006_s5, %s1012_s18 }
  0x11   : > { %v919_v6 = vunpack.c.0.s8 %v370_v5  ;;  %v377_v9 = vrot.slane %v376_v8, 4 }
  0x12   : > { %v383_v10 = vsel %vm375_vm0, %v373_v7, -inf }
  0x13   : > { %v427_v11 = vrot.slane %v919_v6, %v915_v2  ;;  %v431_v12 = vrot.slane %v919_v6, %v917_v3  ;;  %v378_v13 = vmax.f32 %v376_v8, %v377_v9  ;;  %v384_v14 = vrot.slane %v383_v10, 4 }
  0x14   : > { %vm473_vm3 = vcmp.ne.s32.totalorder %v919_v6, 0 }
  0x15   : > { %v435_v15 = vrot.slane %v427_v11, %v915_v2  ;;  %v439_v16 = vrot.slane %v431_v12, %v915_v2  ;;  %v379_v17 = vrot.slane %v378_v13, 2  ;;  %v385_v18 = vmax.f32 %v383_v10, %v384_v14 }
  0x17   : > { %vm440_vm1 = vcmp.eq.s32.totalorder %v423_v1, %v435_v15  ;;  %vm441_vm2 = vcmp.eq.s32.totalorder %v423_v1, %v439_v16  ;;  %v380_v19 = vmax.f32 %v378_v13, %v379_v17  ;;  %v386_v20 = vrot.slane %v385_v18, 2 }
  0x18   : > { %v442_v21 = vsel %vm440_vm1, %v369_v4, 0.0  ;;  %v443_v24 = vsel %vm441_vm2, %v373_v7, 0.0  ;;  %v856_v16 = vmov 0.0  }
  0x19   : > { %v381_v22 = vrot.slane %v380_v19, 1  ;;  %v387_v23 = vmax.f32 %v385_v18, %v386_v20  ;;  %v444_v27 = vsel %vm375_vm0, %v442_v21, 0.0  ;;  %v451_v28 = vsel %vm375_vm0, %v443_v24, 0.0  ;;  %365 = vst.msk [vmem:[%s952_s7] sm:$0x1] %vm364_vm5, %v856_v16 }
  0x1a   : > { %v445_v30 = vrot.slane %v444_v27, 4  ;;  %v452_v32 = vrot.slane %v451_v28, 4  ;;  %v479_v17 = vsel %vm473_vm3, 1.0, %v856_v16  ;;  %366 = vst.msk [vmem:[%s960_s10] sm:$0x1] %vm364_vm5, %v856_v16 }
  0x1b   : > { %v382_v25 = vmax.f32 %v380_v19, %v381_v22  ;;  %v388_v26 = vrot.slane %v387_v23, 1  ;;  %v561_v24 = vrot.slane %v479_v17, %v917_v3  ;;  %367 = vst.msk [vmem:[%s966_s13] sm:$0x1] %vm364_vm5, %v856_v16  ;;  %368 = vst.msk [vmem:[%s976_s16] sm:$0x1] %vm364_vm5, %v856_v16 }
  0x1c   : > { %v446_v34 = vadd.f32 %v445_v30, %v444_v27  ;;  %v453_v36 = vadd.f32 %v452_v32, %v451_v28 }
  0x1d   : > { %v389_v29 = vmax.f32 %v387_v23, %v388_v26  ;;  %v557_v23 = vrot.slane %v479_v17, %v915_v2 }
  0x1e   : > { %v447_v37 = vrot.slane %v446_v34, 2  ;;  %v454_v38 = vrot.slane %v453_v36, 2 }
  0x1f   : > { %v392_v31 = vcombine.low %v382_v25, %v389_v29 }
  0x20   : > { %v448_v39 = vadd.f32 %v447_v37, %v446_v34  ;;  %v455_v40 = vadd.f32 %v454_v38, %v453_v36  ;;  %v564_v36 = vsel %vm481_vm4, %v557_v23, 0.0  ;;  %v565_v37 = vsel %vm481_vm4, %v561_v24, 0.0 }
  0x21   : > { %v394_v33 = vsub.f32 %v369_v4, %v392_v31 }
  0x22   : > { %v449_v41 = vrot.slane %v448_v39, 1  ;;  %v456_v42 = vrot.slane %v455_v40, 1 }
  0x23   : > { %v395_v35 = vmul.f32 1.442695, %v394_v33 }
  0x24   : > { %v450_v44 = vadd.f32 %v449_v41, %v448_v39  ;;  %v457_v47 = vadd.f32 %v456_v42, %v455_v40 }
  0x25   : > { %818 = vpow2.f32 %v395_v35 }
  0x26   : > { %v465_v52 = vsub.f32 %v450_v44, %v382_v25  ;;  %v466_v53 = vsub.f32 %v457_v47, %v389_v29 }
  0x28   : > { %v467_v58 = vmul.f32 1.442695, %v465_v52  ;;  %v469_v59 = vmul.f32 1.442695, %v466_v53 }
  0x2a   : > { %820 = vpow2.f32 %v467_v58 }
  0x2b   : > { %822 = vpow2.f32 %v469_v59 }
  0x32   : > { %v819_v43 = vpop.eup %818 }
  0x33   : > { %v398_v45 = vcombine.high %v819_v43, %v819_v43  ;;  %v400_v46 = vsel %vm375_vm0, %v819_v43, 0.0 }
  0x34   : > { %v401_v48 = vrot.slane %v400_v46, 4 }
  0x35   : > { %v407_v49 = vsel %vm375_vm0, %v398_v45, 0.0 }
  0x36   : > { %v402_v50 = vadd.f32 %v401_v48, %v400_v46  ;;  %v408_v51 = vrot.slane %v407_v49, 4 }
  0x37   : > { %v821_v1 = vpop.eup %820 }
  0x38   : > { %v403_v54 = vrot.slane %v402_v50, 2  ;;  %v409_v55 = vadd.f32 %v408_v51, %v407_v49  ;;  %v823_v4 = vpop.eup %822 }
  0x3a   : > { %v404_v56 = vadd.f32 %v403_v54, %v402_v50  ;;  %v410_v57 = vrot.slane %v409_v55, 2 }
  0x3c   : > { %v405_v60 = vrot.slane %v404_v56, 1  ;;  %v411_v61 = vadd.f32 %v410_v57, %v409_v55 }
  0x3e   : > { %v406_v62 = vadd.f32 %v405_v60, %v404_v56  ;;  %v412_v63 = vrot.slane %v411_v61, 1 }
  0x40   : > { %v413_v0 = vadd.f32 %v412_v63, %v411_v61  ;;  %824 = vrcp.f32 %v406_v62 }
  0x41   : > { %826 = vlog2.f32 %v406_v62 }
  0x42   : > { %828 = vlog2.f32 %v413_v0 }
  0x43   : > { %830 = vrcp.f32 %v413_v0 }
  0x4d   : > { %v825_v5 = vpop.eup %824 }
  0x4e   : > { %v827_v7 = vpop.eup %826  ;;  %v471_v10 = vmul.f32 %v825_v5, %v821_v1 }
  0x4f   : > { %v829_v8 = vpop.eup %828  ;;  %v417_v9 = vmul.f32 0.6931472, %v827_v7 }
  0x50   : > { %v831_v11 = vpop.eup %830  ;;  %v419_v12 = vmul.f32 0.6931472, %v829_v8 }
  0x51   : > { %v420_v13 = vadd.f32 %v417_v9, %v382_v25  ;;  %v472_v14 = vmul.f32 %v831_v11, %v823_v4  ;;  %v462_v15 = vcombine.low %v825_v5, %v831_v11  ;;  %v480_v5 = vld [vmem:[%s952_s7] sm:$0x1] }
  0x52   : > { %v421_v18 = vadd.f32 %v419_v12, %v389_v29  ;;  %v498_v9 = vld [vmem:[%s960_s10] sm:$0x1] }
  0x53   : > { %v458_v19 = vsub.f32 %v420_v13, %v450_v44  ;;  %v476_v20 = vcombine.low %v471_v10, %v472_v14  ;;  %v464_v21 = vmul.f32 %v819_v43, %v462_v15  ;;  %v525_v10 = vld [vmem:[%s966_s13] sm:$0x1] }
  0x54   : > { %v459_v22 = vsub.f32 %v421_v18, %v457_v47  ;;  %v552_v12 = vld [vmem:[%s976_s16] sm:$0x1] }
  0x55   : > { %v482_v26 = vsel %vm481_vm4, %v458_v19, 0.0  ;;  %v478_v27 = vsel %vm473_vm3, %v476_v20, 0.0  ;;  %v503_v6 = vrot.slane %v464_v21, %v915_v2  ;;  %v507_v25 = vrot.slane %v464_v21, %v917_v3 }
  0x56   : > { %v483_v28 = vsel %vm481_vm4, %v459_v22, 0.0  ;;  %v530_v29 = vrot.slane %v478_v27, %v915_v2  ;;  %v534_v30 = vrot.slane %v478_v27, %v917_v3  ;;  %v566_v3 = vadd.f32 %v565_v37, %v564_v36 }
  0x57   : > { %v484_v31 = vadd.f32 %v483_v28, %v482_v26  ;;  %v510_v32 = vsel %vm481_vm4, %v503_v6, 0.0  ;;  %v511_v33 = vsel %vm481_vm4, %v507_v25, 0.0 }
  0x58   : > { %v537_v34 = vsel %vm481_vm4, %v530_v29, 0.0  ;;  %v538_v35 = vsel %vm481_vm4, %v534_v30, 0.0  ;;  %v512_v38 = vadd.f32 %v511_v33, %v510_v32 }
  0x59   : > { %485 = vadd.xlane.f32.xlu0 %v484_v31  ;;  %v539_v2 = vadd.f32 %v538_v35, %v537_v34 }
  0x5b   : > { %540 = vadd.xlane.f32.xlu1 %v539_v2 }
  0x5d   : > { %513 = vadd.xlane.f32.xlu0 %v512_v38 }
  0x5f   : > { %567 = vadd.xlane.f32.xlu1 %v566_v3 }
  0xe2   : > { %v486_v39 = vpop.xlane.xlu0 %485 }
  0xe3   : > { %v487_v40 = vrot.slane %v486_v39, 4 }
  0xe4   : > { %v541_v41 = vpop.xlane.xlu1 %540 }
  0xe5   : > { %v488_v42 = vadd.f32 %v487_v40, %v486_v39  ;;  %v542_v43 = vrot.slane %v541_v41, 4 }
  0xe6   : > { %v514_v44 = vpop.xlane.xlu0 %513 }
  0xe7   : > { %v489_v45 = vrot.slane %v488_v42, 2  ;;  %v543_v46 = vadd.f32 %v542_v43, %v541_v41  ;;  %v515_v47 = vrot.slane %v514_v44, 4 }
  0xe8   : > { %v568_v48 = vpop.xlane.xlu1 %567 }
  0xe9   : > { %v544_v49 = vrot.slane %v543_v46, 2  ;;  %v516_v50 = vadd.f32 %v515_v47, %v514_v44  ;;  %v569_v51 = vrot.slane %v568_v48, 4  ;;  %v490_v52 = vadd.f32 %v489_v45, %v488_v42 }
  0xeb   : > { %v517_v53 = vrot.slane %v516_v50, 2  ;;  %v570_v54 = vadd.f32 %v569_v51, %v568_v48  ;;  %v491_v55 = vrot.slane %v490_v52, 1  ;;  %v545_v56 = vadd.f32 %v544_v49, %v543_v46 }
  0xed   : > { %v518_v57 = vadd.f32 %v517_v53, %v516_v50  ;;  %v571_v58 = vrot.slane %v570_v54, 2  ;;  %v492_v59 = vadd.f32 %v491_v55, %v490_v52  ;;  %v546_v60 = vrot.slane %v545_v56, 1 }
  0xef   : > { %v572_v61 = vadd.f32 %v571_v58, %v570_v54  ;;  %784 = vpush %v492_v59  ;;  %v519_v62 = vrot.slane %v518_v57, 1  ;;  %v547_v1 = vadd.f32 %v546_v60, %v545_v56 }
  0xf1   : > { %v520_v63 = vadd.f32 %v519_v62, %v518_v57  ;;  %v573_v0 = vrot.slane %v572_v61, 1 }
  0xf3   : > { %786 = vpush %v520_v63  ;;  %v574_v4 = vadd.f32 %v573_v0, %v572_v61 }
  0xf4   : > { %788 = vpush %v547_v1 }
  0xf5   : > { %790 = vpush %v574_v4 }
 0x120   : > { %s785_s17 = spop %784 }
 0x121   : > { %v494_v7 = vstv %s785_s17 }
 0x122   : > { %v495_v8 = vadd.f32 %v494_v7, %v480_v5 }
 0x124   : > { %497 = vst.msk [vmem:[%s952_s7] sm:$0x1] %vm364_vm5, %v495_v8  ;;  %s787_s18 = spop %786 }
 0x125   : > { %v522_v11 = vstv %s787_s18  ;;  %s789_s22 = spop %788 }
 0x126   : > { %v523_v13 = vadd.f32 %v522_v11, %v498_v9  ;;  %v549_v14 = vstv %s789_s22  ;;  %s791_s23 = spop %790 }
 0x127   : > { %v550_v15 = vadd.f32 %v549_v14, %v525_v10  ;;  %v576_v16 = vstv %s791_s23 }
 0x128   : > { %524 = vst.msk [vmem:[%s960_s10] sm:$0x1] %vm364_vm5, %v523_v13  ;;  %v577_v17 = vadd.f32 %v576_v16, %v552_v12 }
 0x129   : > { %551 = vst.msk [vmem:[%s966_s13] sm:$0x1] %vm364_vm5, %v550_v15 }
 0x12a   : > { %578 = vst.msk [vmem:[%s976_s16] sm:$0x1] %vm364_vm5, %v577_v17 }
 0x12b PF: > { %s16_s20 = sadd.s32 1, %s854_s20   ;;  %s1007_s18 = smov %s850_s19 }
 0x12c   : > { %p13_p5 = scmp.ge.s32.totalorder %s16_s20, 4   ;;  %s1008_s19 = smov %s1010_s21 }
 0x12e   :  { %15 = sbr.rel (!%p13_p5) target bundleno = 2 (0x2), region = 101 }

</bundles_post_ra>
